<compile_context>
chip_gen: v7x
topology: tpu7x:2x2x1
jax: 0.10.0
libtpu: 0.0.40
codegen_flags: <defaults>
</compile_context>

<pallas_src>
import jax
import jax.numpy as jnp
from jax.experimental import pallas as pl
from jax.experimental.pallas import tpu as pltpu


def _conv_bn_relu_kernel(w_ref, p_ref, scale_ref, bias_ref, o_ref):
    # w_ref:     (C_pad, K_pad)  conv weights reshaped to a GEMM matrix
    # p_ref:     (K_pad, TN)     im2col patch tile (lane-dense)
    # scale_ref: (C_pad, 1)      folded BN scale = gamma / sqrt(var + eps)
    # bias_ref:  (C_pad, 1)      folded bias    = beta + scale * (conv_bias - mean)
    # o_ref:     (C_pad, TN)     output tile
    acc = jnp.dot(w_ref[...], p_ref[...], preferred_element_type=jnp.float32)  # MXU
    y = acc * scale_ref[...] + bias_ref[...]                                   # VPU epilogue
    o_ref[...] = jnp.maximum(y, 0.0).astype(o_ref.dtype)                       # ReLU


def _round_up(x, m):
    return (x + m - 1) // m * m


def conv_block_forward(x, weight, conv_bias, gamma, beta, running_mean, running_var,
                       *, stride=(1, 1), padding=(1, 1), eps=1e-5):
    """Fused Conv2d + BatchNorm2d(eval) + ReLU. x: (B, C_in, H, W) -> (B, C_out, oH, oW)."""
    B, C_in, H, W = x.shape
    C_out, C_in_w, KH, KW = weight.shape
    assert C_in_w == C_in, "weight / input channel mismatch"
    sh, sw = stride
    ph, pw = padding
    out_h = (H + 2 * ph - KH) // sh + 1
    out_w = (W + 2 * pw - KW) // sw + 1

    # --- im2col (layout only; every FLOP happens inside the Pallas kernel) ----
    x_pad = jnp.pad(x.astype(jnp.float32), ((0, 0), (0, 0), (ph, ph), (pw, pw)))
    windows = [
        x_pad[:, :, kh:kh + sh * (out_h - 1) + 1:sh, kw:kw + sw * (out_w - 1) + 1:sw]
        for kh in range(KH) for kw in range(KW)
    ]
    cols = jnp.stack(windows, axis=2)                       # (B, C_in, KH*KW, oH, oW)
    K = C_in * KH * KW
    N = B * out_h * out_w
    patches = cols.reshape(B, K, out_h * out_w)             # merge (C_in, KH*KW), (oH, oW)
    patches = jnp.transpose(patches, (1, 0, 2)).reshape(K, N)   # (K, N), N ordered (b, hw)

    # --- alignment padding -----------------------------------------------------
    # Sublane (8) alignment for K and C_out; lane (128) alignment for N so every
    # store is a full, unmasked vst.  Zero padding is exact (zero rows of P match
    # zero cols of W; padded output rows are discarded).
    K_pad = _round_up(K, 8)
    C_pad = _round_up(C_out, 8)
    N_pad = _round_up(N, 128)
    if K_pad != K:
        patches = jnp.pad(patches, ((0, K_pad - K), (0, 0)))
    if N_pad != N:
        patches = jnp.pad(patches, ((0, 0), (0, N_pad - N)))

    # Fold conv bias + eval-mode BN into per-channel scale / bias.
    scale = (gamma / jnp.sqrt(running_var + eps)).astype(jnp.float32)
    bias_eff = (beta + scale * (conv_bias - running_mean)).astype(jnp.float32)
    w_mat = weight.reshape(C_out, K).astype(jnp.float32)
    if K_pad != K:
        w_mat = jnp.pad(w_mat, ((0, 0), (0, K_pad - K)))
    if C_pad != C_out:
        w_mat = jnp.pad(w_mat, ((0, C_pad - C_out), (0, 0)))
        scale = jnp.pad(scale, (0, C_pad - C_out))
        bias_eff = jnp.pad(bias_eff, (0, C_pad - C_out))

    # --- tile width: biggest that divides N_pad and fits a conservative VMEM budget
    vmem_budget = 8 * 1024 * 1024
    tn = 128
    for cand in (2048, 1024, 512, 256, 128):
        if N_pad % cand == 0:
            # double-buffered patch + output tiles, plus resident weight/scale/bias
            blk_bytes = 4 * (2 * (K_pad + C_pad) * cand + C_pad * K_pad + 2 * C_pad)
            if blk_bytes <= vmem_budget:
                tn = cand
                break

    flops = 2 * C_pad * K_pad * N_pad
    bytes_accessed = 4 * (K_pad * N_pad + C_pad * K_pad + C_pad * N_pad + 2 * C_pad)

    out_flat = pl.pallas_call(
        _conv_bn_relu_kernel,
        out_shape=jax.ShapeDtypeStruct((C_pad, N_pad), jnp.float32),
        grid=(N_pad // tn,),
        in_specs=[
            pl.BlockSpec((C_pad, K_pad), lambda n: (0, 0)),   # weights (VMEM-resident)
            pl.BlockSpec((K_pad, tn), lambda n: (0, n)),      # patch tile
            pl.BlockSpec((C_pad, 1), lambda n: (0, 0)),       # folded scale
            pl.BlockSpec((C_pad, 1), lambda n: (0, 0)),       # folded bias
        ],
        out_specs=pl.BlockSpec((C_pad, tn), lambda n: (0, n)),
        compiler_params=pltpu.CompilerParams(
            dimension_semantics=("parallel",),
            vmem_limit_bytes=32 * 1024 * 1024,
        ),
        cost_estimate=pl.CostEstimate(flops=flops, transcendentals=0,
                                      bytes_accessed=bytes_accessed),
    )(w_mat, patches, scale[:, None], bias_eff[:, None])

    out = out_flat[:C_out, :N].reshape(C_out, B, out_h, out_w)
    return jnp.transpose(out, (1, 0, 2, 3))                  # (B, C_out, oH, oW)


def _reference(x, weight, conv_bias, gamma, beta, mean, var,
               eps=1e-5, stride=(1, 1), padding=(1, 1)):
    # Pure-JAX reference mirroring F.relu(bn(conv(x))) in eval mode.
    z = jax.lax.conv_general_dilated(
        x, weight, window_strides=stride,
        padding=[(padding[0], padding[0]), (padding[1], padding[1])],
        dimension_numbers=("NCHW", "OIHW", "NCHW"),
        precision=jax.lax.Precision.HIGHEST)
    z = z + conv_bias[None, :, None, None]
    y = (gamma[None, :, None, None] * (z - mean[None, :, None, None])
         / jnp.sqrt(var[None, :, None, None] + eps) + beta[None, :, None, None])
    return jnp.maximum(y, 0.0)


if __name__ == "__main__":
    key = jax.random.PRNGKey(0)
    k1, k2, k3, k4, k5, k6, k7 = jax.random.split(key, 7)
    B, C_in, H, W = 2, 4, 16, 16
    C_out = 8

    x = jax.random.normal(k1, (B, C_in, H, W), dtype=jnp.float32)
    weight = jax.random.normal(k2, (C_out, C_in, 3, 3), dtype=jnp.float32) * 0.2
    conv_bias = jax.random.normal(k3, (C_out,), dtype=jnp.float32) * 0.1
    gamma = 1.0 + 0.1 * jax.random.normal(k4, (C_out,), dtype=jnp.float32)
    beta = 0.1 * jax.random.normal(k5, (C_out,), dtype=jnp.float32)
    running_mean = 0.1 * jax.random.normal(k6, (C_out,), dtype=jnp.float32)
    running_var = jax.random.uniform(k7, (C_out,), dtype=jnp.float32, minval=0.5, maxval=1.5)

    out = conv_block_forward(x, weight, conv_bias, gamma, beta, running_mean, running_var)
    out = jax.block_until_ready(out)

    ref = _reference(x, weight, conv_bias, gamma, beta, running_mean, running_var)
    assert out.shape == (B, C_out, H, W), out.shape
    assert out.dtype == jnp.float32
    assert jnp.allclose(out, ref, atol=1e-3, rtol=1e-3), \
        float(jnp.max(jnp.abs(out - ref)))

    print("KERNEL_OK")
</pallas_src>

<mosaic_0001>
module attributes {stable_mosaic.version = 11 : i64} {
  func.func @_conv_bn_relu_kernel(%arg0: i32, %arg1: memref<8x40xf32, #tpu.memory_space<vmem>>, %arg2: memref<40x512xf32, #tpu.memory_space<vmem>>, %arg3: memref<8x1xf32, #tpu.memory_space<vmem>>, %arg4: memref<8x1xf32, #tpu.memory_space<vmem>>, %arg5: memref<8x512xf32, #tpu.memory_space<vmem>>) attributes {dimension_semantics = [#tpu.dimension_semantics<parallel>], iteration_bounds = array<i64: 1>, scalar_prefetch = 0 : i64, scratch_operands = 0 : i64, tpu.core_type = #tpu.core_type<tc>, window_params = [{pipeline_mode = #tpu.pipeline_mode<synchronous>, transform_indices = @transform_0, window_bounds = array<i64: 8, 40>}, {transform_indices = @transform_1, window_bounds = array<i64: 40, 512>}, {pipeline_mode = #tpu.pipeline_mode<synchronous>, transform_indices = @transform_2, window_bounds = array<i64: 8, 1>}, {pipeline_mode = #tpu.pipeline_mode<synchronous>, transform_indices = @transform_3, window_bounds = array<i64: 8, 1>}, {transform_indices = @transform_4, window_bounds = array<i64: 8, 512>}]} {
    %c0 = arith.constant 0 : index
    %c0_0 = arith.constant 0 : index
    %0 = vector.load %arg1[%c0, %c0_0] : memref<8x40xf32, #tpu.memory_space<vmem>>, vector<8x40xf32>
    %c0_1 = arith.constant 0 : index
    %c0_2 = arith.constant 0 : index
    %1 = vector.load %arg2[%c0_1, %c0_2] : memref<40x512xf32, #tpu.memory_space<vmem>>, vector<40x512xf32>
    %cst = arith.constant dense<0.000000e+00> : vector<8x512xf32>
    %2 = tpu.matmul %0, %1, %cst {dimension_numbers = #tpu.dot_dimension_numbers<[1], [0], [0], [1], [0, 0, 1, 1], [], []>} : vector<8x40xf32>, vector<40x512xf32>, vector<8x512xf32> -> vector<8x512xf32>
    %c0_3 = arith.constant 0 : index
    %c0_4 = arith.constant 0 : index
    %3 = vector.load %arg3[%c0_3, %c0_4] : memref<8x1xf32, #tpu.memory_space<vmem>>, vector<8x1xf32>
    %4 = vector.broadcast %3 : vector<8x1xf32> to vector<8x512xf32>
    %5 = arith.mulf %2, %4 : vector<8x512xf32>
    %c0_5 = arith.constant 0 : index
    %c0_6 = arith.constant 0 : index
    %6 = vector.load %arg4[%c0_5, %c0_6] : memref<8x1xf32, #tpu.memory_space<vmem>>, vector<8x1xf32>
    %7 = vector.broadcast %6 : vector<8x1xf32> to vector<8x512xf32>
    %8 = arith.addf %5, %7 : vector<8x512xf32>
    %cst_7 = arith.constant 0.000000e+00 : f32
    %9 = vector.broadcast %cst_7 : f32 to vector<8x512xf32>
    %10 = arith.maximumf %8, %9 : vector<8x512xf32>
    %c0_8 = arith.constant 0 : index
    %c0_9 = arith.constant 0 : index
    %11 = vector.load %arg5[%c0_8, %c0_9] : memref<8x512xf32, #tpu.memory_space<vmem>>, vector<8x512xf32>
    tpu.vector_store %arg5[%c0_8, %c0_9], %10 {strides = array<i32>} : memref<8x512xf32, #tpu.memory_space<vmem>>, vector<8x512xf32>,
    return
  }
  func.func @transform_0(%arg0: i32) -> (i32, i32) {
    %c0_i32 = arith.constant 0 : i32
    %c0_i32_0 = arith.constant 0 : i32
    %c0_i32_1 = arith.constant 0 : i32
    return %c0_i32, %c0_i32_0 : i32, i32
  }
  func.func @transform_1(%arg0: i32) -> (i32, i32) {
    %c0_i32 = arith.constant 0 : i32
    %c0_i32_0 = arith.constant 0 : i32
    return %c0_i32, %arg0 : i32, i32
  }
  func.func @transform_2(%arg0: i32) -> (i32, i32) {
    %c0_i32 = arith.constant 0 : i32
    %c0_i32_0 = arith.constant 0 : i32
    %c0_i32_1 = arith.constant 0 : i32
    return %c0_i32, %c0_i32_0 : i32, i32
  }
  func.func @transform_3(%arg0: i32) -> (i32, i32) {
    %c0_i32 = arith.constant 0 : i32
    %c0_i32_0 = arith.constant 0 : i32
    %c0_i32_1 = arith.constant 0 : i32
    return %c0_i32, %c0_i32_0 : i32, i32
  }
  func.func @transform_4(%arg0: i32) -> (i32, i32) {
    %c0_i32 = arith.constant 0 : i32
    %c0_i32_0 = arith.constant 0 : i32
    return %c0_i32, %arg0 : i32, i32
  }
}

</mosaic_0001>

<bundles_post_ra>
// kernel: tpu_custom_call.1
= control target key start
LH: loop header
LB: loop body
LE: loop exit
PB: predicated region body
PF: predicated region fallthrough
CT: control target
= control target key end

     0   :  { %9 = vsyncpa [#allocation3], 0  ;;  %s379_s0 = inlined_call_operand.vmem [shape: f32[8,40], index: 0, kind: input, shape index: {}]   ;;  %s380_s1 = inlined_call_operand.hbm [shape: f32[40,512], index: 1, kind: input, shape index: {}]   ;;  %s381_s2 = inlined_call_operand.vmem [shape: f32[8,1], index: 2, kind: input, shape index: {}]   ;;  %s382_s3 = inlined_call_operand.vmem [shape: f32[8,1], index: 3, kind: input, shape index: {}]   ;;  %s383_s4 = inlined_call_operand.hbm [shape: f32[8,512], index: 4, kind: output, shape index: {}]  }
   0x1   :  { %10 = vsyncpa [#allocation4], 0  ;;  %s315_s15 = smov [#allocation2]   ;;  %s267_s19 = scalar_lea.hbm %s380_s1, 2560 }
   0x2   :  { %s18_s16 = sshll.u32 %s315_s15, 4  ;;  %p268_p0 = scmp.ne.s32.totalorder %s380_s1, %s267_s19  ;;  %s19_s16 = int_to_ptr.vmem [resolvable:$true] %s18_s16 }
   0x3   :  { %p271_p1 = scmp.lt.u32.totalorder %s267_s19, %s380_s1 }
   0x5   :  { %p273_p2 = pnand %p271_p1, %p268_p0 }
   0x7   :  { %276 = shalt.err (!%p273_p2)
}
   0x8   :  { %s277_s24 = scalar_lea.vmem %s19_s16, 2560  ;;  %p282_p4 = scmp.lt.s32.totalorder %s19_s16, %s19_s16 }
   0x9   :  { %p278_p3 = scmp.ne.s32.totalorder %s19_s16, %s277_s24  ;;  %p283_p5 = scmp.lt.s32.totalorder %s277_s24, %s277_s24 }
   0xb   :  { %p284_p6 = por %p283_p5, %p282_p4 }
   0xd   :  { %p285_p7 = pnand %p284_p6, %p278_p3 }
   0xf   :  { %288 = shalt.err (!%p285_p7)
}
  0x10   :  { %s316_s25 = smov 512   ;;  %s317_s26 = smov 32  }
  0x11   :  { %24 = dma.hbm_to_vmem [thread:$0]  %s380_s1, 2560, %s19_s16, [#allocation3], %s316_s25, %s316_s25, %s317_s26  }
  0x12   :  { %311 = dma.done.wait [#allocation3], 2560  }
  0x13   :  { %312 = vsyncadd [#allocation3], 4294964736  ;;  %v318_v0 = vmov 0.0   ;;  %v319_v1 = vmov 0   ;;  %v34_v2 = vld [vmem:[#allocation2 + $0x8] sm:$0xff]  ;;  %v36_v4 = vld [vmem:[#allocation2 + $0x18] sm:$0xff] }
  0x14   :  { %121 = vmatprep.mubr.f32.mxu0 %v318_v0  ;;  %192 = vmatprep.mubr.f32.mxu1 %v318_v0  ;;  %v38_v3 = vld [vmem:[#allocation2 + $0x28] sm:$0xff]  ;;  %v40_v6 = vld [vmem:[#allocation2 + $0x38] sm:$0xff]  ;;  %v33_v7 = vld [vmem:[#allocation2] sm:$0xff]  ;;  %vm53_vm0 = vcmask 326656  }
  0x15   :  { %266 = vset.pattern.permute.xlu0 %v319_v1  ;;  %v244_v5 = vpack.c.bf16 %v38_v3, %v34_v2  ;;  %v37_v8 = vld [vmem:[#allocation2 + $0x20] sm:$0xff]  ;;  %v252_v9 = vpack.c.bf16 %v40_v6, %v36_v4  ;;  %v35_v11 = vld [vmem:[#allocation2 + $0x10] sm:$0xff]  ;;  %v42_v13 = vld [vmem:[#allocation2 + $0x48] sm:$0xff] }
  0x16   :  { %v246_v10 = vpack.c.bf16 %v37_v8, %v33_v7  ;;  %v39_v12 = vld [vmem:[#allocation2 + $0x30] sm:$0xff]  ;;  %v46_v15 = vld [vmem:[#allocation2 + $0x68] sm:$0xff]  ;;  %v44_v16 = vld [vmem:[#allocation2 + $0x58] sm:$0xff] }
  0x17   :  { %245 = vmatprep.subr.bf16.mxu0 %v244_v5  ;;  %v254_v14 = vpack.c.bf16 %v39_v12, %v35_v11  ;;  %v48_v17 = vld [vmem:[#allocation2 + $0x78] sm:$0xff]  ;;  %253 = vmatprep.subr.bf16.mxu1 %v252_v9  ;;  %v248_v18 = vpack.c.bf16 %v46_v15, %v42_v13  ;;  %v41_v20 = vld [vmem:[#allocation2 + $0x40] sm:$0xff]  ;;  %v43_v22 = vld [vmem:[#allocation2 + $0x50] sm:$0xff] }
  0x18   :  { %247 = vmatpush1.bf16.msra.mxu0 %v246_v10  ;;  %v256_v19 = vpack.c.bf16 %v48_v17, %v44_v16  ;;  %v45_v21 = vld [vmem:[#allocation2 + $0x60] sm:$0xff]  ;;  %v47_v24 = vld [vmem:[#allocation2 + $0x70] sm:$0xff]  ;;  %v50_v26 = vld [vmem:[#allocation2 + $0x88] sm:$0xff] }
  0x19   :  { %255 = vmatpush1.bf16.msra.mxu1 %v254_v14  ;;  %v250_v23 = vpack.c.bf16 %v45_v21, %v41_v20  ;;  %249 = vmatprep.subr.bf16.mxu0 %v248_v18  ;;  %v258_v25 = vpack.c.bf16 %v47_v24, %v43_v22  ;;  %v52_v27 = vld [vmem:[#allocation2 + $0x98] sm:$0xff]  ;;  %v199_v28 = vld [vmem:[%s381_s2] sm:$0xff]  ;;  %v51_v31 = vld [vmem:[#allocation2 + $0x90] sm:$0xff] }
  0x1a   :  { %257 = vmatprep.subr.bf16.mxu1 %v256_v19  ;;  %202 = vperm.xlu0 %266, %v199_v28   ;;  %v49_v29 = vld [vmem:[#allocation2 + $0x80] sm:$0xff] }
  0x1b   :  { %v209_v30 = vld [vmem:[%s382_s3] sm:$0xff] }
  0x1c   :  { %251 = vmatpush1.bf16.msra.mxu0 %v250_v23  ;;  %v32_v32 = vld [vmem:[%s379_s0] sm:$0xff]  ;;  %s320_s0 = smov [#allocation5]  }
  0x1d   :  { %259 = vmatpush1.bf16.msra.mxu1 %v258_v25  ;;  %65 = vmatprep.subr.mxu0 %v50_v26  ;;  %s233_s2 = sshll.u32 %s320_s0, 4  ;;  %s234_s2 = int_to_ptr.vmem [resolvable:$true] %s233_s2 }
  0x1e   :  { %136 = vmatprep.subr.mxu1 %v52_v27  ;;  %212 = vperm.xlu0 %266, %v209_v30   ;;  %s289_s3 = scalar_lea.vmem %s234_s2, 512  ;;  %p294_p9 = scmp.lt.s32.totalorder %s234_s2, %s234_s2 }
  0x1f   :  { %p290_p8 = scmp.ne.s32.totalorder %s234_s2, %s289_s3  ;;  %p295_p10 = scmp.lt.s32.totalorder %s289_s3, %s289_s3 }
  0x20   :  { %66 = vmatpush1.msra.mxu0 %v49_v29 }
  0x21   :  { %137 = vmatpush1.msra.mxu1 %v51_v31  ;;  %242 = vmatmul.mubr.msk.f32.vlgmr.msra.gmra.mrb[0].mxu0 %vm53_vm0, %v32_v32  ;;  %p296_p11 = por %p295_p10, %p294_p9 }
  0x22   :  { %243 = vmatmul.mubr.msk.f32.vlgmr.msra.gmra.mrb[0].mxu1 %vm53_vm0, %v32_v32 }
  0x23   :  { %p297_p12 = pnand %p296_p11, %p290_p8 }
  0x99   :  { %v203_v33 = vpop.permute.xlu0 %202 }
  0x9d   :  { %v213_v38 = vpop.permute.xlu0 %212 }
  0xf4   :  { %v123_v34 = vpop.f32.mrb[0].mxu0 }
  0xf5   :  { %v205_v35 = vmul.f32 %v203_v33, %v123_v34  ;;  %v194_v36 = vpop.f32.mrb[0].mxu1  ;;  %v125_v37 = vpop.f32.mrb[1].mxu0 }
  0xf6   :  { %v207_v39 = vmul.f32 %v203_v33, %v194_v36  ;;  %v206_v40 = vmul.f32 %v203_v33, %v125_v37  ;;  %v196_v41 = vpop.f32.mrb[1].mxu1 }
  0xf7   :  { %v215_v42 = vadd.f32 %v213_v38, %v205_v35  ;;  %v208_v43 = vmul.f32 %v203_v33, %v196_v41 }
  0xf8   :  { %v217_v44 = vadd.f32 %v213_v38, %v207_v39  ;;  %v216_v45 = vadd.f32 %v213_v38, %v206_v40 }
  0xf9   :  { %v219_v46 = vmax.f32 %v215_v42, 0.0  ;;  %v218_v47 = vadd.f32 %v213_v38, %v208_v43 }
  0xfa   :  { %v221_v48 = vmax.f32 %v217_v44, 0.0  ;;  %v220_v49 = vmax.f32 %v216_v45, 0.0 }
  0xfb   :  { %223 = vst [vmem:[#allocation5] sm:$0xff] %v219_v46  ;;  %v222_v50 = vmax.f32 %v218_v47, 0.0 }
  0xfc   :  { %225 = vst [vmem:[#allocation5 + $0x10] sm:$0xff] %v221_v48  ;;  %224 = vst [vmem:[#allocation5 + $0x8] sm:$0xff] %v220_v49 }
  0xfd   :  { %226 = vst [vmem:[#allocation5 + $0x18] sm:$0xff] %v222_v50 }
  0xfe   :  { %300 = shalt.err (!%p297_p12)
}
  0xff   :  { %s301_s10 = scalar_lea.hbm %s383_s4, 512 }
 0x100   :  { %p302_p13 = scmp.ne.s32.totalorder %s383_s4, %s301_s10  ;;  %p305_p0 = scmp.lt.u32.totalorder %s301_s10, %s383_s4 }
 0x102   :  { %p307_p1 = pnand %p305_p0, %p302_p13 }
 0x104   :  { %310 = shalt.err (!%p307_p1)
}
 0x105   :  { %236 = dma.vmem_to_hbm [thread:$0]  %s234_s2, 512, %s383_s4, [#allocation4]  }
 0x106   :  { %313 = dma.done.wait [#allocation4], 512  }
 0x107   :  { %314 = vsyncadd [#allocation4], 4294966784 }
 0x108   :  { %240 = vsyncpa [#allocation3], 1 }
 0x109   :  { %241 = vsyncpa [#allocation4], 1 }

</bundles_post_ra>
